<compile_context>
chip_gen: v7x
topology: tpu7x:2x2x1
jax: 0.10.0
libtpu: 0.0.40
codegen_flags: <defaults>
</compile_context>

<pallas_src>
import jax
import jax.numpy as jnp
from jax.experimental import pallas as pl
from jax.experimental.pallas import tpu as pltpu


def _softplus(x):
    # Numerically-stable softplus: max(x,0) + log1p(exp(-|x|))
    return jnp.maximum(x, 0.0) + jnp.log1p(jnp.exp(-jnp.abs(x)))


def _round_up(n, m):
    return ((n + m - 1) // m) * m


def policy_net_kernel(x_ref,
                      w1_ref, b1_ref,
                      w2_ref, b2_ref,
                      wmu_ref, bmu_ref,
                      wstd_ref, bstd_ref,
                      mu_ref, std_ref):
    x = x_ref[...]

    # fc1 + relu
    h1 = jnp.dot(x, w1_ref[...], preferred_element_type=jnp.float32) + b1_ref[...]
    h1 = jnp.maximum(h1, 0.0)

    # fc2 + relu
    h2 = jnp.dot(h1, w2_ref[...], preferred_element_type=jnp.float32) + b2_ref[...]
    h2 = jnp.maximum(h2, 0.0)

    # mu / std heads: two tiny matmuls, two exact-width (TB, A) stores.
    mu_logit = jnp.dot(h2, wmu_ref[...], preferred_element_type=jnp.float32) + bmu_ref[...]
    std_logit = jnp.dot(h2, wstd_ref[...], preferred_element_type=jnp.float32) + bstd_ref[...]

    mu_ref[...] = jnp.tanh(mu_logit).astype(mu_ref.dtype)
    std_ref[...] = (_softplus(std_logit) + 1e-8).astype(std_ref.dtype)


def policy_net_forward(x, params, *, tile_b=1024, core_parallel=False):
    """x: [B, state_dim] float32. params: dict of weights/biases (see init_params).

    core_parallel=True uses pltpu.CORE_PARALLEL on the batch axis (v7x: shard
    the grid across both TensorCores). Default keeps plain "parallel", which
    is safe on every generation.
    """
    B, state_dim = x.shape
    A = params["wmu"].shape[1]

    # Adaptive batch tiling: minimize padding while keeping tiles big enough
    # to amortize per-grid-step overhead.
    n_tiles = pl.cdiv(B, tile_b)
    if n_tiles == 1:
        # Single tile: block == full array, no sublane/pad constraint at all.
        TB, B_pad = B, B
    else:
        TB = _round_up(pl.cdiv(B, n_tiles), 8)
        B_pad = n_tiles * TB
    if B_pad != B:
        # At most a handful of rows (< 8 * n_tiles), not a full-TB pad pass.
        x = jnp.pad(x, ((0, B_pad - B), (0, 0)))

    grid = (B_pad // TB,)

    # x / outputs are tiled over the batch grid; weights/biases stay resident.
    x_spec = pl.BlockSpec((TB, state_dim), lambda i: (i, 0))
    resident = lambda a: pl.BlockSpec(a.shape, lambda i: (0, 0))
    head_spec = pl.BlockSpec((TB, A), lambda i: (i, 0))

    args = (
        x,
        params["w1"], params["b1"],
        params["w2"], params["b2"],
        params["wmu"], params["bmu"],
        params["wstd"], params["bstd"],
    )
    in_specs = [x_spec] + [resident(a) for a in args[1:]]

    batch_sem = pltpu.CORE_PARALLEL if core_parallel else "parallel"

    mu, std = pl.pallas_call(
        policy_net_kernel,
        out_shape=(
            jax.ShapeDtypeStruct((B_pad, A), jnp.float32),
            jax.ShapeDtypeStruct((B_pad, A), jnp.float32),
        ),
        grid=grid,
        in_specs=in_specs,
        out_specs=(head_spec, head_spec),
        compiler_params=pltpu.CompilerParams(
            dimension_semantics=(batch_sem,),
        ),
    )(*args)

    if B_pad != B:
        mu, std = mu[:B], std[:B]
    return mu, std


def init_params(key, state_dim, hidden_dim, action_dim):
    """Deterministic synthetic parameters (PyTorch Linear shapes, stored transposed)."""
    h2 = hidden_dim // 2
    keys = jax.random.split(key, 8)

    def lin(kw, kb, fan_in, fan_out):
        bound = 1.0 / jnp.sqrt(fan_in)
        w = jax.random.uniform(kw, (fan_in, fan_out), jnp.float32, -bound, bound)
        b = jax.random.uniform(kb, (1, fan_out), jnp.float32, -bound, bound)
        return w, b

    w1, b1 = lin(keys[0], keys[1], state_dim, hidden_dim)
    w2, b2 = lin(keys[2], keys[3], hidden_dim, h2)
    wmu, bmu = lin(keys[4], keys[5], h2, action_dim)
    wstd, bstd = lin(keys[6], keys[7], h2, action_dim)
    return dict(w1=w1, b1=b1, w2=w2, b2=b2,
                wmu=wmu, bmu=bmu, wstd=wstd, bstd=bstd)


def reference_forward(x, p):
    """Plain-JAX reference for correctness checking."""
    h1 = jax.nn.relu(x @ p["w1"] + p["b1"])
    h2 = jax.nn.relu(h1 @ p["w2"] + p["b2"])
    mu = jnp.tanh(h2 @ p["wmu"] + p["bmu"])
    std = jax.nn.softplus(h2 @ p["wstd"] + p["bstd"]) + 1e-8
    return mu, std


if __name__ == "__main__":
    # Small shapes consistent with the module: PolicyNet(state_dim=16, hidden_dim=32, action_dim=4)
    B, state_dim, hidden_dim, action_dim = 8, 16, 32, 4

    key = jax.random.PRNGKey(0)
    kx, kp = jax.random.split(key)
    x = jax.random.normal(kx, (B, state_dim), jnp.float32)
    params = init_params(kp, state_dim, hidden_dim, action_dim)

    mu, std = policy_net_forward(x, params)
    jax.block_until_ready((mu, std))

    mu_ref, std_ref = reference_forward(x, params)
    assert mu.shape == mu_ref.shape and std.shape == std_ref.shape
    assert jnp.allclose(mu, mu_ref, atol=1e-5), "mu mismatch vs reference"
    assert jnp.allclose(std, std_ref, atol=1e-5), "std mismatch vs reference"

    # Larger batch, single adaptive tile (no padding, grid of 1).
    B2 = 600
    x2 = jax.random.normal(jax.random.PRNGKey(1), (B2, state_dim), jnp.float32)
    mu2, std2 = policy_net_forward(x2, params)
    jax.block_until_ready((mu2, std2))
    mu2_ref, std2_ref = reference_forward(x2, params)
    assert jnp.allclose(mu2, mu2_ref, atol=1e-5), "mu mismatch vs reference (big batch)"
    assert jnp.allclose(std2, std2_ref, atol=1e-5), "std mismatch vs reference (big batch)"

    # Same batch forced through a multi-tile grid (exercises adaptive TB & pipelining).
    mu3, std3 = policy_net_forward(x2, params, tile_b=256)
    jax.block_until_ready((mu3, std3))
    assert jnp.allclose(mu3, mu2_ref, atol=1e-5), "mu mismatch vs reference (multi-tile)"
    assert jnp.allclose(std3, std2_ref, atol=1e-5), "std mismatch vs reference (multi-tile)"

    print("KERNEL_OK")
</pallas_src>

<mosaic_0001>
module attributes {stable_mosaic.version = 11 : i64} {
  func.func @policy_net_kernel(%arg0: i32, %arg1: memref<8x16xf32, #tpu.memory_space<vmem>>, %arg2: memref<16x32xf32, #tpu.memory_space<vmem>>, %arg3: memref<1x32xf32, #tpu.memory_space<vmem>>, %arg4: memref<32x16xf32, #tpu.memory_space<vmem>>, %arg5: memref<1x16xf32, #tpu.memory_space<vmem>>, %arg6: memref<16x4xf32, #tpu.memory_space<vmem>>, %arg7: memref<1x4xf32, #tpu.memory_space<vmem>>, %arg8: memref<16x4xf32, #tpu.memory_space<vmem>>, %arg9: memref<1x4xf32, #tpu.memory_space<vmem>>, %arg10: memref<8x4xf32, #tpu.memory_space<vmem>>, %arg11: memref<8x4xf32, #tpu.memory_space<vmem>>) attributes {dimension_semantics = [#tpu.dimension_semantics<parallel>], iteration_bounds = array<i64: 1>, scalar_prefetch = 0 : i64, scratch_operands = 0 : i64, tpu.core_type = #tpu.core_type<tc>, window_params = [{transform_indices = @transform_0, window_bounds = array<i64: 8, 16>}, {pipeline_mode = #tpu.pipeline_mode<synchronous>, transform_indices = @transform_1, window_bounds = array<i64: 16, 32>}, {pipeline_mode = #tpu.pipeline_mode<synchronous>, transform_indices = @transform_2, window_bounds = array<i64: 1, 32>}, {pipeline_mode = #tpu.pipeline_mode<synchronous>, transform_indices = @transform_3, window_bounds = array<i64: 32, 16>}, {pipeline_mode = #tpu.pipeline_mode<synchronous>, transform_indices = @transform_4, window_bounds = array<i64: 1, 16>}, {pipeline_mode = #tpu.pipeline_mode<synchronous>, transform_indices = @transform_5, window_bounds = array<i64: 16, 4>}, {pipeline_mode = #tpu.pipeline_mode<synchronous>, transform_indices = @transform_6, window_bounds = array<i64: 1, 4>}, {pipeline_mode = #tpu.pipeline_mode<synchronous>, transform_indices = @transform_7, window_bounds = array<i64: 16, 4>}, {pipeline_mode = #tpu.pipeline_mode<synchronous>, transform_indices = @transform_8, window_bounds = array<i64: 1, 4>}, {transform_indices = @transform_9, window_bounds = array<i64: 8, 4>}, {transform_indices = @transform_10, window_bounds = array<i64: 8, 4>}]} {
    %c0 = arith.constant 0 : index
    %c0_0 = arith.constant 0 : index
    %0 = vector.load %arg1[%c0, %c0_0] : memref<8x16xf32, #tpu.memory_space<vmem>>, vector<8x16xf32>
    %c0_1 = arith.constant 0 : index
    %c0_2 = arith.constant 0 : index
    %1 = vector.load %arg2[%c0_1, %c0_2] : memref<16x32xf32, #tpu.memory_space<vmem>>, vector<16x32xf32>
    %cst = arith.constant dense<0.000000e+00> : vector<8x32xf32>
    %2 = tpu.matmul %0, %1, %cst {dimension_numbers = #tpu.dot_dimension_numbers<[1], [0], [0], [1], [0, 0, 1, 1], [], []>} : vector<8x16xf32>, vector<16x32xf32>, vector<8x32xf32> -> vector<8x32xf32>
    %c0_3 = arith.constant 0 : index
    %c0_4 = arith.constant 0 : index
    %3 = vector.load %arg3[%c0_3, %c0_4] : memref<1x32xf32, #tpu.memory_space<vmem>>, vector<1x32xf32>
    %4 = vector.broadcast %3 : vector<1x32xf32> to vector<8x32xf32>
    %5 = arith.addf %2, %4 : vector<8x32xf32>
    %cst_5 = arith.constant 0.000000e+00 : f32
    %6 = vector.broadcast %cst_5 : f32 to vector<8x32xf32>
    %7 = arith.maximumf %5, %6 : vector<8x32xf32>
    %c0_6 = arith.constant 0 : index
    %c0_7 = arith.constant 0 : index
    %8 = vector.load %arg4[%c0_6, %c0_7] : memref<32x16xf32, #tpu.memory_space<vmem>>, vector<32x16xf32>
    %cst_8 = arith.constant dense<0.000000e+00> : vector<8x16xf32>
    %9 = tpu.matmul %7, %8, %cst_8 {dimension_numbers = #tpu.dot_dimension_numbers<[1], [0], [0], [1], [0, 0, 1, 1], [], []>} : vector<8x32xf32>, vector<32x16xf32>, vector<8x16xf32> -> vector<8x16xf32>
    %c0_9 = arith.constant 0 : index
    %c0_10 = arith.constant 0 : index
    %10 = vector.load %arg5[%c0_9, %c0_10] : memref<1x16xf32, #tpu.memory_space<vmem>>, vector<1x16xf32>
    %11 = vector.broadcast %10 : vector<1x16xf32> to vector<8x16xf32>
    %12 = arith.addf %9, %11 : vector<8x16xf32>
    %cst_11 = arith.constant 0.000000e+00 : f32
    %13 = vector.broadcast %cst_11 : f32 to vector<8x16xf32>
    %14 = arith.maximumf %12, %13 : vector<8x16xf32>
    %c0_12 = arith.constant 0 : index
    %c0_13 = arith.constant 0 : index
    %15 = vector.load %arg6[%c0_12, %c0_13] : memref<16x4xf32, #tpu.memory_space<vmem>>, vector<16x4xf32>
    %cst_14 = arith.constant dense<0.000000e+00> : vector<8x4xf32>
    %16 = tpu.matmul %14, %15, %cst_14 {dimension_numbers = #tpu.dot_dimension_numbers<[1], [0], [0], [1], [0, 0, 1, 1], [], []>} : vector<8x16xf32>, vector<16x4xf32>, vector<8x4xf32> -> vector<8x4xf32>
    %c0_15 = arith.constant 0 : index
    %c0_16 = arith.constant 0 : index
    %17 = vector.load %arg7[%c0_15, %c0_16] : memref<1x4xf32, #tpu.memory_space<vmem>>, vector<1x4xf32>
    %18 = vector.broadcast %17 : vector<1x4xf32> to vector<8x4xf32>
    %19 = arith.addf %16, %18 : vector<8x4xf32>
    %c0_17 = arith.constant 0 : index
    %c0_18 = arith.constant 0 : index
    %20 = vector.load %arg8[%c0_17, %c0_18] : memref<16x4xf32, #tpu.memory_space<vmem>>, vector<16x4xf32>
    %cst_19 = arith.constant dense<0.000000e+00> : vector<8x4xf32>
    %21 = tpu.matmul %14, %20, %cst_19 {dimension_numbers = #tpu.dot_dimension_numbers<[1], [0], [0], [1], [0, 0, 1, 1], [], []>} : vector<8x16xf32>, vector<16x4xf32>, vector<8x4xf32> -> vector<8x4xf32>
    %c0_20 = arith.constant 0 : index
    %c0_21 = arith.constant 0 : index
    %22 = vector.load %arg9[%c0_20, %c0_21] : memref<1x4xf32, #tpu.memory_space<vmem>>, vector<1x4xf32>
    %23 = vector.broadcast %22 : vector<1x4xf32> to vector<8x4xf32>
    %24 = arith.addf %21, %23 : vector<8x4xf32>
    %25 = math.tanh %19 : vector<8x4xf32>
    %c0_22 = arith.constant 0 : index
    %c0_23 = arith.constant 0 : index
    %26 = vector.load %arg10[%c0_22, %c0_23] : memref<8x4xf32, #tpu.memory_space<vmem>>, vector<8x4xf32>
    tpu.vector_store %arg10[%c0_22, %c0_23], %25 {strides = array<i32>} : memref<8x4xf32, #tpu.memory_space<vmem>>, vector<8x4xf32>,
    %cst_24 = arith.constant 0.000000e+00 : f32
    %27 = vector.broadcast %cst_24 : f32 to vector<8x4xf32>
    %28 = arith.maximumf %24, %27 : vector<8x4xf32>
    %29 = math.absf %24 : vector<8x4xf32>
    %cst_25 = arith.constant 0.000000e+00 : f32
    %30 = vector.broadcast %cst_25 : f32 to vector<8x4xf32>
    %31 = arith.subf %30, %29 : vector<8x4xf32>
    %32 = math.exp %31 : vector<8x4xf32>
    %33 = math.log1p %32 : vector<8x4xf32>
    %34 = arith.addf %28, %33 : vector<8x4xf32>
    %cst_26 = arith.constant 9.99999993E-9 : f32
    %35 = vector.broadcast %cst_26 : f32 to vector<8x4xf32>
    %36 = arith.addf %34, %35 : vector<8x4xf32>
    %c0_27 = arith.constant 0 : index
    %c0_28 = arith.constant 0 : index
    %37 = vector.load %arg11[%c0_27, %c0_28] : memref<8x4xf32, #tpu.memory_space<vmem>>, vector<8x4xf32>
    tpu.vector_store %arg11[%c0_27, %c0_28], %36 {strides = array<i32>} : memref<8x4xf32, #tpu.memory_space<vmem>>, vector<8x4xf32>,
    return
  }
  func.func @transform_0(%arg0: i32) -> (i32, i32) {
    %c0_i32 = arith.constant 0 : i32
    %c0_i32_0 = arith.constant 0 : i32
    return %arg0, %c0_i32 : i32, i32
  }
  func.func @transform_1(%arg0: i32) -> (i32, i32) {
    %c0_i32 = arith.constant 0 : i32
    %c0_i32_0 = arith.constant 0 : i32
    %c0_i32_1 = arith.constant 0 : i32
    return %c0_i32, %c0_i32_0 : i32, i32
  }
  func.func @transform_2(%arg0: i32) -> (i32, i32) {
    %c0_i32 = arith.constant 0 : i32
    %c0_i32_0 = arith.constant 0 : i32
    %c0_i32_1 = arith.constant 0 : i32
    return %c0_i32, %c0_i32_0 : i32, i32
  }
  func.func @transform_3(%arg0: i32) -> (i32, i32) {
    %c0_i32 = arith.constant 0 : i32
    %c0_i32_0 = arith.constant 0 : i32
    %c0_i32_1 = arith.constant 0 : i32
    return %c0_i32, %c0_i32_0 : i32, i32
  }
  func.func @transform_4(%arg0: i32) -> (i32, i32) {
    %c0_i32 = arith.constant 0 : i32
    %c0_i32_0 = arith.constant 0 : i32
    %c0_i32_1 = arith.constant 0 : i32
    return %c0_i32, %c0_i32_0 : i32, i32
  }
  func.func @transform_5(%arg0: i32) -> (i32, i32) {
    %c0_i32 = arith.constant 0 : i32
    %c0_i32_0 = arith.constant 0 : i32
    %c0_i32_1 = arith.constant 0 : i32
    return %c0_i32, %c0_i32_0 : i32, i32
  }
  func.func @transform_6(%arg0: i32) -> (i32, i32) {
    %c0_i32 = arith.constant 0 : i32
    %c0_i32_0 = arith.constant 0 : i32
    %c0_i32_1 = arith.constant 0 : i32
    return %c0_i32, %c0_i32_0 : i32, i32
  }
  func.func @transform_7(%arg0: i32) -> (i32, i32) {
    %c0_i32 = arith.constant 0 : i32
    %c0_i32_0 = arith.constant 0 : i32
    %c0_i32_1 = arith.constant 0 : i32
    return %c0_i32, %c0_i32_0 : i32, i32
  }
  func.func @transform_8(%arg0: i32) -> (i32, i32) {
    %c0_i32 = arith.constant 0 : i32
    %c0_i32_0 = arith.constant 0 : i32
    %c0_i32_1 = arith.constant 0 : i32
    return %c0_i32, %c0_i32_0 : i32, i32
  }
  func.func @transform_9(%arg0: i32) -> (i32, i32) {
    %c0_i32 = arith.constant 0 : i32
    %c0_i32_0 = arith.constant 0 : i32
    return %arg0, %c0_i32 : i32, i32
  }
  func.func @transform_10(%arg0: i32) -> (i32, i32) {
    %c0_i32 = arith.constant 0 : i32
    %c0_i32_0 = arith.constant 0 : i32
    return %arg0, %c0_i32 : i32, i32
  }
}

</mosaic_0001>

<bundles_post_ra>
// kernel: tpu_custom_call.1
= control target key start
LH: loop header
LB: loop body
LE: loop exit
PB: predicated region body
PF: predicated region fallthrough
CT: control target
= control target key end

     0   :  { %v472_v0 = vmov 0.0|0.0   ;;  %vm473_vm0 = vmmov 0   ;;  %v474_v3 = vmov 0.0   ;;  %vm44_vm1 = vcmask 130048   ;;  %s590_s1 = inlined_call_operand.vmem [shape: f32[16,32], index: 1, kind: input, shape index: {}]   ;;  %s591_s3 = inlined_call_operand.vmem [shape: f32[32,16], index: 3, kind: input, shape index: {}]   ;;  %s592_s0 = inlined_call_operand.vmem [shape: f32[8,16], index: 0, kind: input, shape index: {}]   ;;  %s593_s2 = inlined_call_operand.vmem [shape: f32[1,32], index: 2, kind: input, shape index: {}]   ;;  %s594_s5 = inlined_call_operand.vmem [shape: f32[16,4], index: 5, kind: input, shape index: {}]   ;;  %s595_s4 = inlined_call_operand.vmem [shape: f32[1,16], index: 4, kind: input, shape index: {}]   ;;  %s596_s7 = inlined_call_operand.vmem [shape: f32[16,4], index: 7, kind: input, shape index: {}]   ;;  %s597_s6 = inlined_call_operand.vmem [shape: f32[1,4], index: 6, kind: input, shape index: {}]   ;;  %s598_s8 = inlined_call_operand.vmem [shape: f32[1,4], index: 8, kind: input, shape index: {}]   ;;  %s599_s9 = inlined_call_operand.vmem [shape: f32[8,4], index: 9, kind: output, shape index: {0}]   ;;  %s600_s10 = inlined_call_operand.vmem [shape: f32[8,4], index: 10, kind: output, shape index: {1}]  }
   0x1   :  { %448 = vmatprep.subr.bf16.mxu0 %v472_v0  ;;  %v35_v1 = vld [vmem:[%s590_s1] sm:$0xff]  ;;  %v36_v2 = vld [vmem:[%s590_s1 + $0x8] sm:$0xff]  ;;  %420 = vmatprep.mubr.msk.f32.mxu0 %vm473_vm0, %v474_v3  ;;  %v121_v9 = vld [vmem:[%s591_s3 + $0x10] sm:$0xff]  ;;  %vm130_vm2 = vcmask 261120   ;;  %vm367_vm3 = vcmask 31744  }
   0x2   :  { %v449_v4 = vpack.c.bf16 %v36_v2, %v35_v1  ;;  %451 = vmatprep.subr.bf16.mxu1 %v472_v0  ;;  %v119_v5 = vld [vmem:[%s591_s3] sm:$0xff]  ;;  %v120_v6 = vld [vmem:[%s591_s3 + $0x8] sm:$0xff]  ;;  %431 = vmatprep.mubr.msk.f32.mxu1 %vm473_vm0, %v474_v3  ;;  %v122_v10 = vld [vmem:[%s591_s3 + $0x18] sm:$0xff] }
   0x3   :  { %v452_v7 = vpack.c.bf16 %v120_v6, %v119_v5  ;;  %v34_v8 = vld [vmem:[%s592_s0] sm:$0xff]  ;;  %v455_v11 = vpack.c.bf16 %v122_v10, %v121_v9  ;;  %v206_v18 = vld [vmem:[%s594_s5 + $0x8] sm:$0xff] }
   0x4   :  { %450 = vmatpush3.bf16.msra.mxu0 %v449_v4  ;;  %v394_v12 = vld [vmem:[%s593_s2] ss:$0 sm:$0xff]  ;;  %v288_v22 = vld [vmem:[%s596_s7 + $0x8] sm:$0xff] }
   0x5   :  { %453 = vmatpush3.bf16.msra.mxu1 %v452_v7  ;;  %457 = vmatprep.subr.bf16.mxu0 %v472_v0  ;;  %v205_v17 = vld [vmem:[%s594_s5] sm:$0xff] }
   0x6   :  { %454 = vmatprep.subr.bf16.mxu1 %v472_v0  ;;  %v458_v19 = vpack.c.bf16 %v206_v18, %v205_v17  ;;  %v396_v20 = vld [vmem:[%s595_s4] ss:$0 sm:$0xff] }
   0x7   :  { %421 = vmatmul.mubr.msk.f32.vlgmr.msra.gmra.mrb[0].mxu0 %vm44_vm1, %v34_v8  ;;  %v287_v21 = vld [vmem:[%s596_s7] sm:$0xff] }
   0x8   :  { %438 = vmatprep.mubr.msk.f32.mxu0 %vm473_vm0, %v474_v3  ;;  %459 = vmatpush3.bf16.msra.mxu0 %v458_v19  ;;  %v461_v26 = vpack.c.bf16 %v288_v22, %v287_v21  ;;  %v398_v28 = vld [vmem:[%s597_s6] ss:$0 sm:$0xff] }
   0x9   :  { %456 = vmatpush3.bf16.msra.mxu1 %v455_v11  ;;  %460 = vmatprep.subr.bf16.mxu0 %v472_v0  ;;  %v400_v32 = vld [vmem:[%s598_s8] ss:$0 sm:$0xff] }
  0xda   :  { %v114_v13 = vpop.f32.mrb[0].mxu0 }
  0xdb   :  { %v115_v14 = vadd.f32 %v394_v12, %v114_v13  ;;  %v422_v15 = vpop.f32.mrb[1].mxu0 }
  0xdd   :  { %v118_v16 = vmax.f32 %v115_v14, 0.0 }
  0xdf   :  { %432 = vmatmul.mubr.msk.f32.vlgmr.msra.gmra.mrb[0].mxu1 %vm130_vm2, %v118_v16 }
 0x1b2   :  { %v200_v23 = vpop.f32.mrb[0].mxu1 }
 0x1b3   :  { %v201_v24 = vadd.f32 %v396_v20, %v200_v23  ;;  %v433_v25 = vpop.f32.mrb[1].mxu1 }
 0x1b5   :  { %v204_v27 = vmax.f32 %v201_v24, 0.0 }
 0x1b7   :  { %439 = vmatmul.mubr.msk.f32.vlgmr.msra.gmra.mrb[2].mxu0 %vm44_vm1, %v204_v27 }
 0x1b8   :  { %462 = vmatpush3.bf16.msra.mxu0 %v461_v26  ;;  %445 = vmatprep.mubr.msk.f32.mxu0 %vm473_vm0, %v474_v3 }
 0x1bb   :  { %446 = vmatmul.mubr.msk.f32.vlgmr.msra.gmra.mrb[4].mxu0 %vm44_vm1, %v204_v27 }
 0x28a   :  { %v283_v29 = vpop.f32.mrb[2].mxu0 }
 0x28b   :  { %v284_v30 = vadd.f32 %v398_v28, %v283_v29  ;;  %v440_v31 = vpop.f32.mrb[3].mxu0 }
 0x28d   :  { %466 = vtanh.f32 %v284_v30 }
 0x28e   :  { %v362_v33 = vpop.f32.mrb[4].mxu0 }
 0x28f   :  { %v363_v34 = vadd.f32 %v400_v32, %v362_v33  ;;  %v447_v35 = vpop.f32.mrb[5].mxu0 }
 0x291   :  { %v370_v36 = vand.u32 2147483647, %v363_v34  ;;  %v369_v48 = vmax.f32 %v363_v34, 0.0 }
 0x293   :  { %v371_v37 = vsub.f32 0.0, %v370_v36 }
 0x295   :  { %v372_v38 = vmul.f32 1.442695, %v371_v37 }
 0x297   :  { %v467_v39 = vpop.eup %466  ;;  %468 = vpow2.f32 %v372_v38 }
 0x298   :  { %368 = vst.msk [vmem:[%s599_s9] sm:$0xff] %vm367_vm3, %v467_v39 }
 0x2a1   :  { %v469_v40 = vpop.eup %468 }
 0x2a2   :  { %v374_v41 = vadd.f32 1.0, %v469_v40  ;;  %v377_v42 = vmul.f32 -0.5, %v469_v40  ;;  %v380_v44 = vand.u32 2147483647, %v469_v40 }
 0x2a4   :  { %470 = vlog2.f32 %v374_v41  ;;  %v378_v43 = vadd.f32 1.0, %v377_v42  ;;  %vm381_vm4 = vcmp.lt.f32.partialorder %v380_v44, 0.0004427343 }
 0x2a6   :  { %v379_v47 = vmul.f32 %v469_v40, %v378_v43 }
 0x2ae   :  { %v471_v45 = vpop.eup %470 }
 0x2af   :  { %v376_v46 = vmul.f32 0.6931472, %v471_v45 }
 0x2b1   :  { %v382_v49 = vsel %vm381_vm4, %v379_v47, %v376_v46 }
 0x2b2   :  { %v383_v50 = vadd.f32 %v382_v49, %v369_v48 }
 0x2b4   :  { %v384_v51 = vadd.f32 1e-08, %v383_v50 }
 0x2b6   :  { %385 = vst.msk [vmem:[%s600_s10] sm:$0xff] %vm367_vm3, %v384_v51 }

</bundles_post_ra>
